<compile_context>
chip_gen: v7x
topology: tpu7x:2x2x1
jax: 0.10.0
libtpu: 0.0.40
codegen_flags: <defaults>
</compile_context>

<pallas_src>
import math

import jax
import jax.numpy as jnp
from jax.experimental import pallas as pl
from jax.experimental.pallas import tpu as pltpu


# --------------------------------------------------------------------------------------
# Kernels
# --------------------------------------------------------------------------------------
def _timestep_embedding_kernel(sample_ref, w1_ref, b1_ref, w2_ref, b2_ref, out_ref):
    # sample_ref: (N, Cin)   resident
    # w1_ref:     (Cin, D)   resident
    # b1_ref:     (1, D)     resident
    # w2_ref:     (D, TN)    streamed per grid step
    # b2_ref:     (1, TN)    streamed per grid step
    # out_ref:    (N, TN)    streamed per grid step
    x = sample_ref[...]
    h = jnp.dot(x, w1_ref[...], preferred_element_type=jnp.float32)
    h = h + b1_ref[...].astype(jnp.float32)
    h = jax.nn.silu(h)                                             # f32 activation (EUP)
    out = jnp.dot(h, w2_ref[...], preferred_element_type=jnp.float32)
    out = out + b2_ref[...].astype(jnp.float32)
    out_ref[...] = out.astype(out_ref.dtype)


def _timestep_embedding_cond_kernel(sample_ref, cond_ref, wc_ref,
                                    w1_ref, b1_ref, w2_ref, b2_ref, out_ref):
    # cond_ref: (N, Ccond) resident, wc_ref: (Ccond, Cin) resident (cond_proj, no bias)
    x = sample_ref[...].astype(jnp.float32) + jnp.dot(
        cond_ref[...], wc_ref[...], preferred_element_type=jnp.float32)
    h = jnp.dot(x, w1_ref[...], preferred_element_type=jnp.float32)
    h = h + b1_ref[...].astype(jnp.float32)
    h = jax.nn.silu(h)
    out = jnp.dot(h, w2_ref[...], preferred_element_type=jnp.float32)
    out = out + b2_ref[...].astype(jnp.float32)
    out_ref[...] = out.astype(out_ref.dtype)


# --------------------------------------------------------------------------------------
# Wrapper
# --------------------------------------------------------------------------------------
def timestep_embedding(sample, params, condition=None, *, tile_n=512):
    """Pallas forward of TimestepEmbedding.

    sample:    (N, Cin)
    condition: optional (N, Ccond); requires params["w_cond"] of shape (Ccond, Cin)
    params:    w1 (Cin, D), b1 (1, D), w2 (D, Dout), b2 (1, Dout)  (weights stored (in, out))
    returns:   (N, Dout) in sample.dtype
    """
    N, Cin = sample.shape
    D = params["w1"].shape[1]
    Dout = params["w2"].shape[1]

    tn = min(tile_n, Dout)
    if Dout % tn != 0:           # fall back to a single column tile if not divisible
        tn = Dout
    grid = (Dout // tn,)

    const2 = lambda j: (0, 0)
    col = lambda j: (0, j)

    in_arrays = []
    in_specs = []

    in_arrays.append(sample)
    in_specs.append(pl.BlockSpec((N, Cin), const2))

    if condition is not None:
        Ccond = condition.shape[1]
        in_arrays.append(condition)
        in_specs.append(pl.BlockSpec((N, Ccond), const2))
        in_arrays.append(params["w_cond"])
        in_specs.append(pl.BlockSpec((Ccond, Cin), const2))
        kernel = _timestep_embedding_cond_kernel
    else:
        kernel = _timestep_embedding_kernel

    in_arrays += [params["w1"], params["b1"], params["w2"], params["b2"]]
    in_specs += [
        pl.BlockSpec((Cin, D), const2),   # w1 resident (small)
        pl.BlockSpec((1, D), const2),     # b1 resident
        pl.BlockSpec((D, tn), col),       # w2 streamed over output columns
        pl.BlockSpec((1, tn), col),       # b2 streamed
    ]
    out_spec = pl.BlockSpec((N, tn), col)  # lane-dense output tile (tn multiple of 128)

    out_dtype = sample.dtype
    out_itemsize = jnp.dtype(out_dtype).itemsize

    # ---- VMEM budget: resident inputs + double-buffered streamed tiles (+ margin) ----
    resident_bytes = sum(a.size * a.dtype.itemsize
                         for a in in_arrays
                         if a is not params["w2"] and a is not params["b2"])
    per_step_bytes = (D * tn * params["w2"].dtype.itemsize
                      + tn * params["b2"].dtype.itemsize
                      + N * tn * out_itemsize)
    vmem_limit = int(2 * resident_bytes + 2 * per_step_bytes + (2 << 20))

    # ---- cost estimate: bandwidth-bound custom call, bytes ~= weight bytes ----
    n_steps = grid[0]
    flops = 2 * N * Cin * D * n_steps + 2 * N * D * Dout
    if condition is not None:
        flops += 2 * N * condition.shape[1] * Cin * n_steps
    bytes_accessed = (resident_bytes + params["w2"].size * params["w2"].dtype.itemsize
                      + params["b2"].size * params["b2"].dtype.itemsize
                      + N * Dout * out_itemsize)
    cost = pl.CostEstimate(flops=flops, transcendentals=N * D * n_steps,
                           bytes_accessed=bytes_accessed)

    return pl.pallas_call(
        kernel,
        out_shape=jax.ShapeDtypeStruct((N, Dout), out_dtype),
        grid=grid,
        in_specs=in_specs,
        out_specs=out_spec,
        compiler_params=pltpu.CompilerParams(
            dimension_semantics=("parallel",),      # column tiles are independent
            vmem_limit_bytes=vmem_limit,
        ),
        cost_estimate=cost,
    )(*in_arrays)


# --------------------------------------------------------------------------------------
# Pure-JAX reference (mirrors PyTorch module semantics)
# --------------------------------------------------------------------------------------
def reference(sample, params, condition=None):
    x = sample.astype(jnp.float32)
    if condition is not None:
        x = x + condition.astype(jnp.float32) @ params["w_cond"].astype(jnp.float32)
    h = jax.nn.silu(x @ params["w1"].astype(jnp.float32) + params["b1"].astype(jnp.float32))
    out = h @ params["w2"].astype(jnp.float32) + params["b2"].astype(jnp.float32)
    return out.astype(sample.dtype)


# --------------------------------------------------------------------------------------
# Parameter prep (weights stored (in, out); biases stored pre-shaped as (1, D))
# --------------------------------------------------------------------------------------
def init_params(key, in_channels, time_embed_dim, out_dim=None, cond_proj_dim=None,
                dtype=jnp.float32):
    out_dim = time_embed_dim if out_dim is None else out_dim
    ks = jax.random.split(key, 5)
    s = 0.02
    p = {
        "w1": (s * jax.random.normal(ks[0], (in_channels, time_embed_dim), jnp.float32)).astype(dtype),
        "b1": (s * jax.random.normal(ks[1], (1, time_embed_dim), jnp.float32)).astype(dtype),
        "w2": (s * jax.random.normal(ks[2], (time_embed_dim, out_dim), jnp.float32)).astype(dtype),
        "b2": (s * jax.random.normal(ks[3], (1, out_dim), jnp.float32)).astype(dtype),
    }
    if cond_proj_dim is not None:
        p["w_cond"] = (s * jax.random.normal(ks[4], (cond_proj_dim, in_channels),
                                             jnp.float32)).astype(dtype)
    return p


# --------------------------------------------------------------------------------------
if __name__ == "__main__":
    N = 2                    # batch
    in_channels = 32
    time_embed_dim = 256     # hidden / output dim
    cond_proj_dim = 16
    tile_n = 128             # -> 2 grid steps over the output columns of linear_2

    key = jax.random.PRNGKey(0)
    k_s, k_c, k_w = jax.random.split(key, 3)
    sample = jax.random.normal(k_s, (N, in_channels), jnp.float32)
    condition = jax.random.normal(k_c, (N, cond_proj_dim), jnp.float32)
    params = init_params(k_w, in_channels, time_embed_dim, cond_proj_dim=cond_proj_dim)

    # --- no-condition path ---
    out = jax.block_until_ready(timestep_embedding(sample, params, tile_n=tile_n))
    ref = jax.block_until_ready(reference(sample, params))
    assert out.shape == (N, time_embed_dim), out.shape
    assert jnp.allclose(out, ref, rtol=1e-4, atol=1e-5), float(jnp.max(jnp.abs(out - ref)))

    # --- with condition (cond_proj) path ---
    out_c = jax.block_until_ready(
        timestep_embedding(sample, params, condition=condition, tile_n=tile_n))
    ref_c = jax.block_until_ready(reference(sample, params, condition=condition))
    assert out_c.shape == (N, time_embed_dim), out_c.shape
    assert jnp.allclose(out_c, ref_c, rtol=1e-4, atol=1e-5), float(jnp.max(jnp.abs(out_c - ref_c)))

    print("KERNEL_OK")
</pallas_src>

<mosaic_0001>
module attributes {stable_mosaic.version = 11 : i64} {
  func.func @_timestep_embedding_kernel(%arg0: i32, %arg1: memref<2x32xf32, #tpu.memory_space<vmem>>, %arg2: memref<32x256xf32, #tpu.memory_space<vmem>>, %arg3: memref<1x256xf32, #tpu.memory_space<vmem>>, %arg4: memref<256x128xf32, #tpu.memory_space<vmem>>, %arg5: memref<1x128xf32, #tpu.memory_space<vmem>>, %arg6: memref<2x128xf32, #tpu.memory_space<vmem>>) attributes {dimension_semantics = [#tpu.dimension_semantics<parallel>], iteration_bounds = array<i64: 2>, scalar_prefetch = 0 : i64, scratch_operands = 0 : i64, tpu.core_type = #tpu.core_type<tc>, window_params = [{pipeline_mode = #tpu.pipeline_mode<synchronous>, transform_indices = @transform_0, window_bounds = array<i64: 2, 32>}, {pipeline_mode = #tpu.pipeline_mode<synchronous>, transform_indices = @transform_1, window_bounds = array<i64: 32, 256>}, {pipeline_mode = #tpu.pipeline_mode<synchronous>, transform_indices = @transform_2, window_bounds = array<i64: 1, 256>}, {transform_indices = @transform_3, window_bounds = array<i64: 256, 128>}, {transform_indices = @transform_4, window_bounds = array<i64: 1, 128>}, {transform_indices = @transform_5, window_bounds = array<i64: 2, 128>}]} {
    %c0 = arith.constant 0 : index
    %c0_0 = arith.constant 0 : index
    %0 = vector.load %arg1[%c0, %c0_0] : memref<2x32xf32, #tpu.memory_space<vmem>>, vector<2x32xf32>
    %c0_1 = arith.constant 0 : index
    %c0_2 = arith.constant 0 : index
    %1 = vector.load %arg2[%c0_1, %c0_2] : memref<32x256xf32, #tpu.memory_space<vmem>>, vector<32x256xf32>
    %cst = arith.constant dense<0.000000e+00> : vector<2x256xf32>
    %2 = tpu.matmul %0, %1, %cst {dimension_numbers = #tpu.dot_dimension_numbers<[1], [0], [0], [1], [0, 0, 1, 1], [], []>} : vector<2x32xf32>, vector<32x256xf32>, vector<2x256xf32> -> vector<2x256xf32>
    %c0_3 = arith.constant 0 : index
    %c0_4 = arith.constant 0 : index
    %3 = vector.load %arg3[%c0_3, %c0_4] : memref<1x256xf32, #tpu.memory_space<vmem>>, vector<1x256xf32>
    %4 = vector.broadcast %3 : vector<1x256xf32> to vector<2x256xf32>
    %5 = arith.addf %2, %4 : vector<2x256xf32>
    %6 = arith.negf %5 : vector<2x256xf32>
    %7 = math.exp %6 : vector<2x256xf32>
    %cst_5 = arith.constant 1.000000e+00 : f32
    %8 = vector.broadcast %cst_5 : f32 to vector<2x256xf32>
    %9 = arith.addf %8, %7 : vector<2x256xf32>
    %10 = arith.divf %8, %9 : vector<2x256xf32>
    %11 = arith.mulf %5, %10 : vector<2x256xf32>
    %c0_6 = arith.constant 0 : index
    %c0_7 = arith.constant 0 : index
    %12 = vector.load %arg4[%c0_6, %c0_7] : memref<256x128xf32, #tpu.memory_space<vmem>>, vector<256x128xf32>
    %cst_8 = arith.constant dense<0.000000e+00> : vector<2x128xf32>
    %13 = tpu.matmul %11, %12, %cst_8 {dimension_numbers = #tpu.dot_dimension_numbers<[1], [0], [0], [1], [0, 0, 1, 1], [], []>} : vector<2x256xf32>, vector<256x128xf32>, vector<2x128xf32> -> vector<2x128xf32>
    %c0_9 = arith.constant 0 : index
    %c0_10 = arith.constant 0 : index
    %14 = vector.load %arg5[%c0_9, %c0_10] : memref<1x128xf32, #tpu.memory_space<vmem>>, vector<1x128xf32>
    %15 = vector.broadcast %14 : vector<1x128xf32> to vector<2x128xf32>
    %16 = arith.addf %13, %15 : vector<2x128xf32>
    %c0_11 = arith.constant 0 : index
    %c0_12 = arith.constant 0 : index
    %17 = vector.load %arg6[%c0_11, %c0_12] : memref<2x128xf32, #tpu.memory_space<vmem>>, vector<2x128xf32>
    tpu.vector_store %arg6[%c0_11, %c0_12], %16 {strides = array<i32>} : memref<2x128xf32, #tpu.memory_space<vmem>>, vector<2x128xf32>,
    return
  }
  func.func @transform_0(%arg0: i32) -> (i32, i32) {
    %c0_i32 = arith.constant 0 : i32
    %c0_i32_0 = arith.constant 0 : i32
    %c0_i32_1 = arith.constant 0 : i32
    return %c0_i32, %c0_i32_0 : i32, i32
  }
  func.func @transform_1(%arg0: i32) -> (i32, i32) {
    %c0_i32 = arith.constant 0 : i32
    %c0_i32_0 = arith.constant 0 : i32
    %c0_i32_1 = arith.constant 0 : i32
    return %c0_i32, %c0_i32_0 : i32, i32
  }
  func.func @transform_2(%arg0: i32) -> (i32, i32) {
    %c0_i32 = arith.constant 0 : i32
    %c0_i32_0 = arith.constant 0 : i32
    %c0_i32_1 = arith.constant 0 : i32
    return %c0_i32, %c0_i32_0 : i32, i32
  }
  func.func @transform_3(%arg0: i32) -> (i32, i32) {
    %c0_i32 = arith.constant 0 : i32
    %c0_i32_0 = arith.constant 0 : i32
    return %c0_i32, %arg0 : i32, i32
  }
  func.func @transform_4(%arg0: i32) -> (i32, i32) {
    %c0_i32 = arith.constant 0 : i32
    %c0_i32_0 = arith.constant 0 : i32
    return %c0_i32, %arg0 : i32, i32
  }
  func.func @transform_5(%arg0: i32) -> (i32, i32) {
    %c0_i32 = arith.constant 0 : i32
    %c0_i32_0 = arith.constant 0 : i32
    return %c0_i32, %arg0 : i32, i32
  }
}

</mosaic_0001>

<bundles_post_ra>
// kernel: tpu_custom_call.1
= control target key start
LH: loop header
LB: loop body
LE: loop exit
PB: predicated region body
PF: predicated region fallthrough
CT: control target
= control target key end

     0   :  { %s1269_s0 = inlined_call_operand.hbm [shape: f32[2,32], index: 0, kind: input, shape index: {}]   ;;  %s1270_s1 = inlined_call_operand.hbm [shape: f32[32,256], index: 1, kind: input, shape index: {}]   ;;  %s1271_s2 = inlined_call_operand.vmem [shape: f32[1,256], index: 2, kind: input, shape index: {}]   ;;  %s1272_s3 = inlined_call_operand.hbm [shape: f32[256,256], index: 3, kind: input, shape index: {}]   ;;  %s1273_s4 = inlined_call_operand.vmem [shape: f32[1,256], index: 4, kind: input, shape index: {}]   ;;  %s1274_s5 = inlined_call_operand.hbm [shape: f32[2,256], index: 5, kind: output, shape index: {}]  }
   0x1   :  { %1280 = sst [smem:[#allocation14_spill]] %s1269_s0 }
   0x2   :  { %10 = vsyncpa [#allocation3], 0 }
   0x3   :  { %11 = vsyncpa [#allocation6], 0 }
   0x4   :  { %12 = vsyncpa [#allocation4], 0 }
   0x5   :  { %14 = vsyncpa [#allocation4 + $0x1], 0  ;;  %s989_s18 = smov 0   ;;  %s991_s19 = smov 0  }
   0x6   :  { %s993_s20 = smov 0   ;;  %s995_s21 = smov 0  }
   0x7 LB: > { %s1010_s22 = sadd.s32 4294967295, %s948_s21   ;;  %s613_s23 = sadd.s32 4294967294, %s948_s21   ;;  %s948_s21 = sphi %s995_s21, %s1305_s21   ;;  %s944_s20 = sphi %s993_s20, %s1304_s20   ;;  %s940_s19 = sphi %s991_s19, %s1303_s19   ;;  %s936_s18 = sphi %s989_s18, %s1302_s18  }
   0x8   : > { %s1014_s24 = sadd.s32 1, %s948_s21   ;;  %s90_s25 = sadd.s32 1, %s944_s20 }
   0x9   : > { %s87_s26 = ssub.s32 %s948_s21, %s1014_s24  ;;  %p97_p0 = scmp.ne.s32.totalorder %s944_s20, %s940_s19 }
   0xa   : > { %p88_p1 = scmp.eq.s32.totalorder %s87_s26, 0  ;;  %p98_p2 = scmp.eq.s32.totalorder %s948_s21, 0 }
   0xb   : > { %p103_p3 = scmp.ne.s32.totalorder %s940_s19, %s936_s18  ;;  %p1275_p4 = scmp.eq.s32.totalorder %s1010_s22, 0 }
   0xc   : > { %s1026_s27 = scalar_select %p88_p1, %s944_s20, %s90_s25  }
   0xd   : > { %p1028_p5 = por %p98_p2, %p97_p0  ;;  %p1034_p6 = por %p1275_p4, %p103_p3 }
   0xe   : > { %1281 = sst [smem:[#allocation13_spill]] %s1026_s27  ;;  %p153_p7 = scmp.eq.s32.totalorder %s1010_s22, 1 }
   0xf   : > { %s1283_s29 = scalar_select %p1034_p6, 1, 0 }
  0x10   : > { %p159_p8 = scmp.eq.s32.totalorder %s613_s23, 1  ;;  %p614_p9 = scmp.ge.s32.totalorder %s948_s21, 1 }
  0x11   : > { %p166_p10 = scmp.lt.s32.totalorder %s948_s21, 3  ;;  %p1041_p11 = por %p153_p7, %p97_p0 }
  0x12   : > { %p1045_p12 = por %p159_p8, %p103_p3  ;;  %s950_s8 = smov [#allocation2]  }
  0x13   : > { %s1284_s30 = scalar_select %p1041_p11, 1, 0 }
  0x14   : > { %s1285_s6 = scalar_select %p1045_p12, 1, 0 }
  0x15   : > { %p1049_p13 = pnand %p614_p9, %p166_p10  ;;  %s179_s9 = sshll.u32 %s950_s8, 4  ;;  %s180_s9 = int_to_ptr.vmem [resolvable:$true] %s179_s9 }
  0x16   : > { %p737_p4 = scmp.lt.s32.totalorder %s948_s21, 2  ;;  %p1287_p0 = scmp.eq.s32.totalorder %s1010_s22, 0 }
  0x17   : > { %s1286_s7 = scalar_select %p1049_p13, 1, 0 }
  0x18   : > { %p720_p2 = pneg %p1049_p13  ;;  %p1065_p3 = pnand %p737_p4, %p1028_p5 }
  0x19   : > { %s951_s12 = smov [#allocation5]   ;;  %s1290_s0 = sld [smem:[#allocation14_spill]] }
  0x1a   : > { %p1059_p7 = pnand %p720_p2, %p1287_p0  ;;  %s189_s13 = sshll.u32 %s951_s12, 4  ;;  %s1069_s13 = int_to_ptr.vmem [resolvable:$true] %s189_s13 }
  0x1b   : > { %s1289_s11 = scalar_select %p1065_p3, 1, 0 }
  0x1c   : > { %p790_p9 = pneg %p1059_p7 }
  0x1f   : > { %s788_s16 = scalar_lea.hbm %s1290_s0, 32 }
  0x20   : > { %p789_p8 = scmp.ne.s32.totalorder %s1290_s0, %s788_s16  ;;  %p795_p10 = scmp.lt.u32.totalorder %s788_s16, %s1290_s0 }
  0x22   : > { %p791_p4 = pnand %p790_p9, %p789_p8 }
  0x24   : > { %p792_p5 = pneg %p791_p4 }
  0x26   : > { %p797_p2 = pnand %p795_p10, %p792_p5 }
  0x28   : > { %800 = shalt.err (!%p797_p2)
}
  0x29   : > { %s801_s28 = scalar_lea.vmem %s180_s9, 32  ;;  %p809_p11 = scmp.lt.s32.totalorder %s180_s9, %s180_s9 }
  0x2a   : > { %p802_p0 = scmp.ne.s32.totalorder %s180_s9, %s801_s28  ;;  %p810_p6 = scmp.lt.s32.totalorder %s801_s28, %s801_s28 }
  0x2c   : > { %p804_p1 = pnand %p802_p0, %p790_p9  ;;  %p811_p13 = por %p810_p6, %p809_p11 }
  0x2e   : > { %p805_p12 = pneg %p804_p1 }
  0x30   : > { %p812_p3 = pnand %p811_p13, %p805_p12 }
  0x32   : > { %815 = shalt.err (!%p812_p3)
}
  0x33   : > { %723 = dma.hbm_to_vmem [thread:$0]  (!%p1059_p7), %s1290_s0, 32, %s180_s9, [#allocation3]  }
  0x34   : > { %s206_s14 = sand.u32 1, %s948_s21   ;;  %s816_s17 = scalar_lea.hbm %s1270_s1, 1024 }
  0x35   : > { %p817_p1 = scmp.ne.s32.totalorder %s1270_s1, %s816_s17  ;;  %p823_p12 = scmp.lt.u32.totalorder %s816_s17, %s1270_s1 }
  0x37   : > { %p819_p6 = pnand %p817_p1, %p790_p9 }
  0x39   : > { %p820_p11 = pneg %p819_p6 }
  0x3b   : > { %p825_p13 = pnand %p823_p12, %p820_p11 }
  0x3d   : > { %828 = shalt.err (!%p825_p13)
}
  0x3e   : > { %s829_s9 = scalar_lea.vmem %s1069_s13, 1024  ;;  %p837_p5 = scmp.lt.s32.totalorder %s1069_s13, %s1069_s13 }
  0x3f   : > { %p830_p3 = scmp.ne.s32.totalorder %s1069_s13, %s829_s9  ;;  %p838_p10 = scmp.lt.s32.totalorder %s829_s9, %s829_s9 }
  0x41   : > { %p832_p8 = pnand %p830_p3, %p790_p9  ;;  %p839_p2 = por %p838_p10, %p837_p5 }
  0x43   : > { %p833_p4 = pneg %p832_p8 }
  0x45   : > { %p840_p0 = pnand %p839_p2, %p833_p4 }
  0x47   : > { %843 = shalt.err (!%p840_p0)
}
  0x48   : > { %s952_s8 = smov 256   ;;  %s953_s12 = smov 16  }
  0x49   : > { %726 = dma.hbm_to_vmem [thread:$0]  (!%p1059_p7), %s1270_s1, 1024, %s1069_s13, [#allocation6], %s952_s8, %s952_s8, %s953_s12  }
  0x4a   : > { %s208_s17 = sand.u32 1, %s944_s20   ;;  %s619_s25 = sshll.u32 %s948_s21, 7 }
  0x4b   : > { %s618_s23 = sshll.u32 %s208_s17, 8  ;;  %s1126_s9 = scalar_lea.hbm %s1272_s3, %s619_s25 }
  0x4c   : > { %s210_s0 = scalar_lea.vmem [#allocation7], %s618_s23  ;;  %s1130_s27 = scalar_lea.sflag [#allocation3], %s206_s14 }
  0x4d   : > { %s216_s10 = sshll.u32 %s210_s0, 4  ;;  %s844_s15 = scalar_lea.hbm %s1126_s9, 4096  ;;  %s1128_s10 = int_to_ptr.vmem [resolvable:$true] %s216_s10 }
  0x4e   : > { %p845_p7 = scmp.ne.s32.totalorder %s1126_s9, %s844_s15  ;;  %p1291_p9 = scmp.ne.s32.totalorder %s1289_s11, 0 }
  0x4f   : > { %s849_s16 = scalar_lea.hbm %s1272_s3, 8192  ;;  %p850_p12 = scmp.lt.u32.totalorder %s1126_s9, %s1272_s3 }
  0x50   : > { %p846_p1 = pneg %p1291_p9  ;;  %p851_p13 = scmp.lt.u32.totalorder %s849_s16, %s844_s15 }
  0x51   : > { %p853_p8 = scmp.lt.u32.totalorder %s844_s15, %s1126_s9 }
  0x52   : > { %p847_p6 = pnand %p846_p1, %p845_p7  ;;  %p852_p3 = por %p851_p13, %p850_p12 }
  0x54   : > { %p848_p11 = pneg %p847_p6  ;;  %p854_p4 = por %p853_p8, %p852_p3 }
  0x56   : > { %p855_p5 = pnand %p854_p4, %p848_p11 }
  0x58   : > { %858 = shalt.err (!%p855_p5)
}
  0x59   : > { %s859_s0 = scalar_lea.vmem %s1128_s10, 4096  ;;  %s954_s14 = smov [#allocation7]  }
  0x5a   : > { %p860_p10 = scmp.ne.s32.totalorder %s1128_s10, %s859_s0  ;;  %s864_s23 = sshll.u32 %s954_s14, 4  ;;  %s865_s23 = int_to_ptr.vmem [resolvable:$false] %s864_s23 }
  0x5b   : > { %s866_s26 = scalar_lea.vmem %s865_s23, 8192  ;;  %p867_p7 = scmp.lt.s32.totalorder %s1128_s10, %s865_s23 }
  0x5c   : > { %p862_p2 = pnand %p860_p10, %p846_p1  ;;  %p868_p6 = scmp.lt.s32.totalorder %s866_s26, %s859_s0 }
  0x5e   : > { %p863_p0 = pneg %p862_p2  ;;  %p869_p12 = por %p868_p6, %p867_p7 }
  0x60   : > { %p870_p13 = pnand %p869_p12, %p863_p0 }
  0x62   : > { %873 = shalt.err (!%p870_p13)
}
  0x63   : > { %s955_s28 = smov 128   ;;  %s956_s15 = smov 8  }
  0x64   : > { %730 = dma.hbm_to_vmem [thread:$0]  (!%p1291_p9), %s1126_s9, 4096, %s1128_s10, %s1130_s27, %s952_s8, %s955_s28, %s956_s15  }
  0x65   : > { %p1292_p1 = scmp.ne.s32.totalorder %s1286_s7, 0 }
  0x66   : > { %p1293_p11 = scmp.eq.s32.totalorder (!%p1292_p1), %s1010_s22, 0 }
  0x67   : > { %234 = sbr.rel (%p1292_p1) target bundleno = 606 (0x25e), region = 40 }
  0x6e   : > { %919 = dma.done.wait (%p1293_p11), [#allocation3], 32   ;;  %p1294_p3 = pmov %p1293_p11 }
  0x70   : > { %921 = vsyncadd (%p1294_p3), [#allocation3], 4294967264  ;;  %p1295_p8 = pmov %p1294_p3 }
  0x71   : > { %p1296_p4 = pmov %p1294_p3 }
  0x72   : > { %923 = dma.done.wait (%p1295_p8), [#allocation6], 1024  }
  0x73   : > { %925 = vsyncadd (%p1296_p4), [#allocation6], 4294966272  ;;  %s244_s11 = sand.u32 1, %s1010_s22   ;;  %s1171_s27 = sand.u32 1, %s940_s19  }
  0x74   : > { %s623_s7 = sshll.u32 %s1171_s27, 8  ;;  %s245_s8 = scalar_lea.sflag [#allocation3], %s244_s11 }
  0x75   : > { %s1174_s9 = scalar_lea.vmem [#allocation7], %s623_s7  ;;  %p1297_p9 = scmp.ne.s32.totalorder %s1283_s29, 0 }
  0x77   : > { %927 = dma.done.wait (%p1297_p9), %s245_s8, 4096  }
  0x78   : > { %929 = vsyncadd (%p1297_p9), %s245_s8, 4294963200  ;;  %v957_v0 = vmov 0.0   ;;  %v283_v1 = vld [vmem:[#allocation5 + $0x8] sm:$0xff]  ;;  %v285_v2 = vld [vmem:[#allocation5 + $0x18] sm:$0xff]  ;;  %vm302_vm0 = vcmask 261120   ;;  %v292_v62 = vlaneseq  ;;  %p278_p5 = scmp.lt.s32.totalorder %s1010_s22, 1 }
  0x79   : > { %370 = vmatprep.mubr.f32.mxu0 %v957_v0  ;;  %v282_v3 = vld [vmem:[#allocation5] sm:$0xff]  ;;  %v668_v4 = vpack.c.bf16 %v285_v2, %v283_v1  ;;  %v284_v5 = vld [vmem:[#allocation5 + $0x10] sm:$0xff]  ;;  %v287_v6 = vld [vmem:[#allocation5 + $0x28] sm:$0xff]  ;;  %s624_s12 = sshll.u32 %s1171_s27, 1  ;;  %s630_s0 = sshll.u32 %s1010_s22, 5 }
  0x7a   : > { %v289_v7 = vld [vmem:[#allocation5 + $0x38] sm:$0xff]  ;;  %v670_v8 = vpack.c.bf16 %v284_v5, %v282_v3  ;;  %v286_v10 = vld [vmem:[#allocation5 + $0x20] sm:$0xff]  ;;  %v288_v11 = vld [vmem:[#allocation5 + $0x30] sm:$0xff]  ;;  %v293_v63 = vshrl.u32 %v292_v62, 7  ;;  %s279_s13 = scalar_select %p278_p5, %s1010_s22, 1 }
  0x7b   : > { %v672_v9 = vpack.c.bf16 %v289_v7, %v287_v6  ;;  %669 = vmatprep.subr.bf16.mxu0 %v668_v4  ;;  %v674_v12 = vpack.c.bf16 %v288_v11, %v286_v10  ;;  %v281_v13 = vld [vmem:[#allocation2] sm:$0x3]  ;;  %v407_v14 = vld [vmem:[%s1174_s9 + $0x80] sm:$0xff]  ;;  %v408_v15 = vld [vmem:[%s1174_s9 + $0x88] sm:$0xff]  ;;  %s277_s14 = scalar_lea.vmem [#allocation8], %s624_s12  ;;  %s1225_s15 = scalar_lea.hbm %s1274_s5, %s630_s0 }
  0x7c   : > { %671 = vmatpush1.bf16.msra.mxu0 %v670_v8  ;;  %v676_v16 = vpack.c.bf16 %v408_v15, %v407_v14  ;;  %v391_v17 = vld [vmem:[%s1174_s9] sm:$0xff]  ;;  %v392_v18 = vld [vmem:[%s1174_s9 + $0x8] sm:$0xff]  ;;  %v409_v20 = vld [vmem:[%s1174_s9 + $0x90] sm:$0xff]  ;;  %v294_v0 = vsub.s32 0, %v293_v63  ;;  %v298_v2 = vsub.s32 1, %v293_v63  ;;  %s280_s25 = scalar_lea.vmem %s1273_s4, %s279_s13  ;;  %s515_s23 = sshll.u32 %s277_s14, 4  ;;  %s1227_s23 = int_to_ptr.vmem [resolvable:$true] %s515_s23 }
  0x7d   : > { %673 = vmatprep.subr.bf16.mxu0 %v672_v9  ;;  %v678_v19 = vpack.c.bf16 %v392_v18, %v391_v17  ;;  %v410_v21 = vld [vmem:[%s1174_s9 + $0x98] sm:$0xff]  ;;  %v393_v23 = vld [vmem:[%s1174_s9 + $0x10] sm:$0xff]  ;;  %v411_v26 = vld [vmem:[%s1174_s9 + $0xa0] sm:$0xff]  ;;  %s502_s11 = scalar_lea.sflag [#allocation4], %s1171_s27  ;;  %s874_s7 = scalar_lea.vmem %s1227_s23, 32 }
  0x7e   : > { %677 = vmatprep.subr.bf16.mxu1 %v676_v16  ;;  %v680_v22 = vpack.c.bf16 %v410_v21, %v409_v20  ;;  %v394_v24 = vld [vmem:[%s1174_s9 + $0x18] sm:$0xff]  ;;  %v412_v27 = vld [vmem:[%s1174_s9 + $0xa8] sm:$0xff]  ;;  %v395_v29 = vld [vmem:[%s1174_s9 + $0x20] sm:$0xff]  ;;  %p875_p10 = scmp.ne.s32.totalorder %s1227_s23, %s874_s7  ;;  %p1298_p2 = scmp.ne.s32.totalorder %s1284_s30, 0 }
  0x7f   : > { %679 = vmatpush3.bf16.msra.mxu1 %v678_v19  ;;  %v682_v25 = vpack.c.bf16 %v394_v24, %v393_v23  ;;  %v684_v28 = vpack.c.bf16 %v412_v27, %v411_v26  ;;  %v396_v30 = vld [vmem:[%s1174_s9 + $0x28] sm:$0xff]  ;;  %v413_v32 = vld [vmem:[%s1174_s9 + $0xb0] sm:$0xff]  ;;  %v414_v33 = vld [vmem:[%s1174_s9 + $0xb8] sm:$0xff]  ;;  %s958_s22 = smov [#allocation8]  }
  0x80   : > { %675 = vmatpush1.bf16.msra.mxu0 %v674_v12  ;;  %681 = vmatprep.subr.bf16.mxu1 %v680_v22  ;;  %v686_v31 = vpack.c.bf16 %v396_v30, %v395_v29  ;;  %v688_v34 = vpack.c.bf16 %v414_v33, %v413_v32  ;;  %v397_v35 = vld [vmem:[%s1174_s9 + $0x30] sm:$0xff]  ;;  %v398_v36 = vld [vmem:[%s1174_s9 + $0x38] sm:$0xff]  ;;  %v415_v38 = vld [vmem:[%s1174_s9 + $0xc0] sm:$0xff]  ;;  %p876_p0 = pnand %p875_p10, %p1298_p2  ;;  %s878_s8 = sshll.u32 %s958_s22, 4  ;;  %s879_s8 = int_to_ptr.vmem [resolvable:$false] %s878_s8 }
  0x81   : > { %v690_v37 = vpack.c.bf16 %v398_v36, %v397_v35  ;;  %v416_v39 = vld [vmem:[%s1174_s9 + $0xc8] sm:$0xff]  ;;  %v399_v41 = vld [vmem:[%s1174_s9 + $0x40] sm:$0xff]  ;;  %v417_v44 = vld [vmem:[%s1174_s9 + $0xd0] sm:$0xff]  ;;  %p881_p6 = scmp.lt.s32.totalorder %s1227_s23, %s879_s8 }
  0x82   : > { %v692_v40 = vpack.c.bf16 %v416_v39, %v415_v38  ;;  %v400_v42 = vld [vmem:[%s1174_s9 + $0x48] sm:$0xff]  ;;  %v418_v45 = vld [vmem:[%s1174_s9 + $0xd8] sm:$0xff]  ;;  %v401_v47 = vld [vmem:[%s1174_s9 + $0x50] sm:$0xff]  ;;  %p877_p7 = pneg %p876_p0 }
  0x83   : > { %625 = vmatmul.mubr.msk.f32.vlgmr.msra.gmra.mrb[0].mxu0 %vm302_vm0, %v281_v13  ;;  %683 = vmatpush3.bf16.msra.mxu1 %v682_v25  ;;  %v694_v43 = vpack.c.bf16 %v400_v42, %v399_v41  ;;  %v696_v46 = vpack.c.bf16 %v418_v45, %v417_v44  ;;  %v402_v48 = vld [vmem:[%s1174_s9 + $0x58] sm:$0xff]  ;;  %v419_v50 = vld [vmem:[%s1174_s9 + $0xe0] sm:$0xff]  ;;  %v420_v51 = vld [vmem:[%s1174_s9 + $0xe8] sm:$0xff] }
  0x84   : > { %685 = vmatprep.subr.bf16.mxu1 %v684_v28  ;;  %v698_v49 = vpack.c.bf16 %v402_v48, %v401_v47  ;;  %v700_v52 = vpack.c.bf16 %v420_v51, %v419_v50  ;;  %v403_v53 = vld [vmem:[%s1174_s9 + $0x60] sm:$0xff]  ;;  %v404_v54 = vld [vmem:[%s1174_s9 + $0x68] sm:$0xff]  ;;  %v421_v56 = vld [vmem:[%s1174_s9 + $0xf0] sm:$0xff] }
  0x85   : > { %v702_v55 = vpack.c.bf16 %v404_v54, %v403_v53  ;;  %v422_v57 = vld [vmem:[%s1174_s9 + $0xf8] sm:$0xff]  ;;  %v405_v59 = vld [vmem:[%s1174_s9 + $0x70] sm:$0xff] }
  0x86   : > { %v704_v58 = vpack.c.bf16 %v422_v57, %v421_v56  ;;  %v406_v60 = vld [vmem:[%s1174_s9 + $0x78] sm:$0xff]  ;;  %s880_s9 = scalar_lea.vmem %s879_s8, 64 }
  0x87   : > { %687 = vmatpush3.bf16.msra.mxu1 %v686_v31  ;;  %v706_v61 = vpack.c.bf16 %v406_v60, %v405_v59  ;;  %v290_v1 = vld [vmem:[%s1271_s2] sm:$0x3]  ;;  %p882_p12 = scmp.lt.s32.totalorder %s880_s9, %s874_s7 }
  0x88   : > { %689 = vmatprep.subr.bf16.mxu1 %v688_v34  ;;  %v295_v3 = vrot.slane %v290_v1, %v294_v0  ;;  %v299_v4 = vrot.slane %v290_v1, %v298_v2  ;;  %v628_v20 = vld [vmem:[%s280_s25] ss:$0 sm:$0xff] }
  0x89   : > { %p883_p13 = por %p882_p12, %p881_p6 }
  0x8b   : > { %691 = vmatpush3.bf16.msra.mxu1 %v690_v37  ;;  %p884_p1 = pnand %p883_p13, %p877_p7 }
  0x8c   : > { %693 = vmatprep.subr.bf16.mxu1 %v692_v40 }
  0x8f   : > { %695 = vmatpush3.bf16.msra.mxu1 %v694_v43 }
  0x90   : > { %697 = vmatprep.subr.bf16.mxu1 %v696_v46 }
  0x93   : > { %699 = vmatpush3.bf16.msra.mxu1 %v698_v49 }
  0x94   : > { %701 = vmatprep.subr.bf16.mxu1 %v700_v52 }
  0x97   : > { %703 = vmatpush3.bf16.msra.mxu1 %v702_v55 }
  0x98   : > { %705 = vmatprep.subr.bf16.mxu1 %v704_v58 }
  0x9b   : > { %707 = vmatpush3.bf16.msra.mxu1 %v706_v61 }
 0x156   : > { %v372_v5 = vpop.f32.mrb[0].mxu0 }
 0x157   : > { %v373_v6 = vadd.f32 %v372_v5, %v295_v3  ;;  %v374_v7 = vpop.f32.mrb[1].mxu0 }
 0x158   : > { %v375_v8 = vadd.f32 %v374_v7, %v299_v4 }
 0x159   : > { %v626_v9 = vmul.f32 -1.442695, %v373_v6 }
 0x15a   : > { %v627_v10 = vmul.f32 -1.442695, %v375_v8 }
 0x15b   : > { %780 = vpow2.f32 %v626_v9 }
 0x15c   : > { %782 = vpow2.f32 %v627_v10 }
 0x165   : > { %v781_v11 = vpop.eup %780 }
 0x166   : > { %v783_v12 = vpop.eup %782  ;;  %v383_v13 = vadd.f32 1.0, %v781_v11 }
 0x167   : > { %v384_v14 = vadd.f32 1.0, %v783_v12 }
 0x168   : > { %784 = vrcp.f32 %v383_v13 }
 0x169   : > { %786 = vrcp.f32 %v384_v14 }
 0x172   : > { %v785_v15 = vpop.eup %784 }
 0x173   : > { %v787_v16 = vpop.eup %786  ;;  %v389_v18 = vmul.f32 %v785_v15, %v373_v6 }
 0x174   : > { %v390_v17 = vmul.f32 %v787_v16, %v375_v8 }
 0x176   : > { %494 = vmatprep.mubr.f32.mxu1 %v390_v17 }
 0x177   : > { %495 = vmatmul.mubr.f32.vlgmr.msra.gmra.mrb[0].mxu1 %v389_v18 }
 0x24a   : > { %v665_v19 = vpop.f32.mrb[0].mxu1 }
 0x24b   : > { %v666_v21 = vpop.f32.mrb[1].mxu1 }
 0x24c   : > { %v667_v22 = vadd.f32 %v666_v21, %v665_v19 }
 0x24e   : > { %v497_v23 = vadd.f32 %v667_v22, %v628_v20 }
 0x250   : > { %500 = vst [vmem:[%s277_s14] sm:$0x3] %v497_v23 }
 0x251   : > { %887 = shalt.err (!%p884_p1)
}
 0x252   : > { %s888_s27 = scalar_lea.hbm %s1225_s15, 32  ;;  %s892_s13 = scalar_lea.hbm %s1274_s5, 64 }
 0x253   : > { %p889_p11 = scmp.ne.s32.totalorder %s1225_s15, %s888_s27  ;;  %p893_p4 = scmp.lt.u32.totalorder %s1225_s15, %s1274_s5 }
 0x254   : > { %p894_p9 = scmp.lt.u32.totalorder %s892_s13, %s888_s27  ;;  %p896_p10 = scmp.lt.u32.totalorder %s888_s27, %s1225_s15 }
 0x255   : > { %p890_p3 = pnand %p889_p11, %p1298_p2 }
 0x256   : > { %p895_p5 = por %p894_p9, %p893_p4 }
 0x257   : > { %p891_p8 = pneg %p890_p3 }
 0x258   : > { %p897_p0 = por %p896_p10, %p895_p5 }
 0x25a   : > { %p898_p7 = pnand %p897_p0, %p891_p8 }
 0x25c   : > { %901 = shalt.err (!%p898_p7)
}
 0x25d   : > { %718 = dma.vmem_to_hbm [thread:$0]  (%p1298_p2), %s1227_s23, 32, %s1225_s15, %s502_s11  }
 0x25e PF: > { %s527_s17 = sand.u32 1, %s936_s18   ;;  %p1299_p6 = scmp.ne.s32.totalorder %s1285_s6, 0 }
 0x25f   : > { %p1300_p12 = scmp.ge.s32.totalorder %s948_s21, 2  ;;  %s528_s25 = scalar_lea.sflag [#allocation4], %s527_s17 }
 0x261   : > { %p732_p13 = pnand %p1300_p12, %p1299_p6 }
 0x263   : > { %931 = dma.done.wait (!%p732_p13), %s528_s25, 32  }
 0x264   : > { %933 = vsyncadd (!%p732_p13), %s528_s25, 4294967264  ;;  %s1301_s0 = sld [smem:[#allocation13_spill]]  ;;  %p17_p1 = scmp.ge.s32.totalorder %s1014_s24, 4  }
 0x265   : > { %s1302_s18 = smov %s940_s19  ;;  %s1303_s19 = smov %s944_s20 }
 0x266   : > { %s1305_s21 = smov %s1014_s24  ;;  %19 = sbr.rel (!%p17_p1) target bundleno = 7 (0x7), region = 95 }
 0x26a   : > { %s1304_s20 = smov %s1301_s0 }
 0x26d   :  { %533 = vsyncpa [#allocation3], 1 }
 0x26e   :  { %535 = vsyncpa [#allocation3 + $0x1], 1 }
 0x26f   :  { %536 = vsyncpa [#allocation6], 1 }
 0x270   :  { %537 = vsyncpa [#allocation4], 1 }
 0x271   :  { %539 = vsyncpa [#allocation4 + $0x1], 1 }

</bundles_post_ra>
